<compile_context>
chip_gen: v6e
topology: v6e:2x2x1
jax: 0.10.0
libtpu: 0.0.40
codegen_flags: <defaults>
</compile_context>

<pallas_src>
import jax
import jax.numpy as jnp
from jax.experimental import pallas as pl
from jax.experimental.pallas import tpu as pltpu

LANE = 128      # TPU vreg lane width
SUBLANE = 8     # TPU vreg sublane count (f32)


def actor_kernel(x_ref, w1_ref, b1_ref, w2_ref, b2_ref, w3_ref, b3_ref,
                 probs_ref):
    x = x_ref[...]                                        # (TB, S) f32

    # layer1 + ReLU
    h1 = jnp.dot(x, w1_ref[...], preferred_element_type=jnp.float32)
    h1 = jnp.maximum(h1 + b1_ref[...], 0.0)

    # layer2 + ReLU
    h2 = jnp.dot(h1, w2_ref[...], preferred_element_type=jnp.float32)
    h2 = jnp.maximum(h2 + b2_ref[...], 0.0)

    # layer3 (logits; padded lanes carry -1e30 bias -> exp() == 0)
    logits = jnp.dot(h2, w3_ref[...], preferred_element_type=jnp.float32)
    logits = logits + b3_ref[...]

    # numerically stable softmax over the (lane-padded) action axis
    m = jnp.max(logits, axis=-1, keepdims=True)
    e = jnp.exp(logits - m)
    denom = jnp.sum(e, axis=-1, keepdims=True)
    inv = pl.reciprocal(denom, approx=True)               # EUP, not VALU divide
    probs_ref[...] = e * inv


def actor_forward(x, params, *, block_b=128):
    """Returns Categorical probabilities, shape (B, action_size)."""
    w1, b1, w2, b2, w3, b3 = params
    B, S = x.shape
    H = w1.shape[1]
    A = w3.shape[1]

    # --- batch tile: sublane-aligned, at most 128 rows ----------------------
    TB = min(block_b, max(SUBLANE, pl.cdiv(B, SUBLANE) * SUBLANE))
    Bp = pl.cdiv(B, TB) * TB
    if Bp != B:
        x = jnp.pad(x, ((0, Bp - B), (0, 0)))

    # --- pad action dim to a full 128-lane slab (lane-dense output) ---------
    Ap = pl.cdiv(A, LANE) * LANE
    if Ap != A:
        # zero weight columns + very negative bias => padded logits -> exp = 0
        w3p = jnp.pad(w3, ((0, 0), (0, Ap - A)))
        b3p = jnp.pad(b3, ((0, 0), (0, Ap - A)), constant_values=-1e30)
    else:
        w3p, b3p = w3, b3

    # weights / biases: constant index_map -> VMEM-resident across grid steps
    const = lambda arr: pl.BlockSpec(arr.shape, lambda i: (0,) * arr.ndim)

    flops = 2 * Bp * (S * H + H * H + H * Ap)
    bytes_accessed = 4 * (Bp * S + S * H + H + H * H + H + H * Ap + Ap
                          + Bp * Ap)
    cost = pl.CostEstimate(flops=flops,
                           transcendentals=Bp * (Ap + 1),
                           bytes_accessed=bytes_accessed)

    probs = pl.pallas_call(
        actor_kernel,
        out_shape=jax.ShapeDtypeStruct((Bp, Ap), jnp.float32),
        grid=(Bp // TB,),
        in_specs=[pl.BlockSpec((TB, S), lambda i: (i, 0)),
                  const(w1), const(b1), const(w2), const(b2),
                  const(w3p), const(b3p)],
        out_specs=pl.BlockSpec((TB, Ap), lambda i: (i, 0)),
        compiler_params=pltpu.CompilerParams(
            dimension_semantics=("parallel",)),
        cost_estimate=cost,
    )(x, w1, b1, w2, b2, w3p, b3p)

    return probs[:B, :A]


def init_actor_params(key, state_size, action_size, hidden=64):
    """Deterministic init mirroring nn.Linear's default U(-1/sqrt(fan_in), +)."""
    def linear(key, fan_in, fan_out):
        kw, kb = jax.random.split(key)
        bound = 1.0 / jnp.sqrt(fan_in)
        w = jax.random.uniform(kw, (fan_in, fan_out), jnp.float32,
                               minval=-bound, maxval=bound)
        b = jax.random.uniform(kb, (1, fan_out), jnp.float32,
                               minval=-bound, maxval=bound)
        return w, b

    k1, k2, k3 = jax.random.split(key, 3)
    w1, b1 = linear(k1, state_size, hidden)
    w2, b2 = linear(k2, hidden, hidden)
    w3, b3 = linear(k3, hidden, action_size)
    return (w1, b1, w2, b2, w3, b3)


if __name__ == "__main__":
    key = jax.random.PRNGKey(0)
    k_params, k_x = jax.random.split(key)

    batch = 8
    state_size = 16
    action_size = 4

    params = init_actor_params(k_params, state_size, action_size)
    x = jax.random.normal(k_x, (batch, state_size), jnp.float32)

    probs = actor_forward(x, params)
    probs = jax.block_until_ready(probs)

    # Reference check in plain JAX (same math as the PyTorch module).
    w1, b1, w2, b2, w3, b3 = params
    h1 = jnp.maximum(x @ w1 + b1, 0.0)
    h2 = jnp.maximum(h1 @ w2 + b2, 0.0)
    logits = h2 @ w3 + b3
    ref = jax.nn.softmax(logits, axis=-1)

    assert probs.shape == (batch, action_size)
    # approx reciprocal has ~1e-4 relative error; allow a small tolerance.
    assert jnp.allclose(probs, ref, atol=2e-3, rtol=2e-3)
    assert jnp.allclose(jnp.sum(probs, axis=-1), 1.0, atol=2e-3)

    # TODO(synk): torch.distributions.Categorical (sampling / log_prob) has no
    # Pallas equivalent; the kernel returns the probability vector that
    # parameterizes it.
    print("KERNEL_OK")
</pallas_src>

<mosaic_0001>
module attributes {stable_mosaic.version = 11 : i64} {
  func.func @actor_kernel(%arg0: i32, %arg1: memref<8x16xf32, #tpu.memory_space<vmem>>, %arg2: memref<16x64xf32, #tpu.memory_space<vmem>>, %arg3: memref<1x64xf32, #tpu.memory_space<vmem>>, %arg4: memref<64x64xf32, #tpu.memory_space<vmem>>, %arg5: memref<1x64xf32, #tpu.memory_space<vmem>>, %arg6: memref<64x128xf32, #tpu.memory_space<vmem>>, %arg7: memref<1x128xf32, #tpu.memory_space<vmem>>, %arg8: memref<8x128xf32, #tpu.memory_space<vmem>>) attributes {dimension_semantics = [#tpu.dimension_semantics<parallel>], iteration_bounds = array<i64: 1>, scalar_prefetch = 0 : i64, scratch_operands = 0 : i64, tpu.core_type = #tpu.core_type<tc>, window_params = [{transform_indices = @transform_0, window_bounds = array<i64: 8, 16>}, {pipeline_mode = #tpu.pipeline_mode<synchronous>, transform_indices = @transform_1, window_bounds = array<i64: 16, 64>}, {pipeline_mode = #tpu.pipeline_mode<synchronous>, transform_indices = @transform_2, window_bounds = array<i64: 1, 64>}, {pipeline_mode = #tpu.pipeline_mode<synchronous>, transform_indices = @transform_3, window_bounds = array<i64: 64, 64>}, {pipeline_mode = #tpu.pipeline_mode<synchronous>, transform_indices = @transform_4, window_bounds = array<i64: 1, 64>}, {pipeline_mode = #tpu.pipeline_mode<synchronous>, transform_indices = @transform_5, window_bounds = array<i64: 64, 128>}, {pipeline_mode = #tpu.pipeline_mode<synchronous>, transform_indices = @transform_6, window_bounds = array<i64: 1, 128>}, {transform_indices = @transform_7, window_bounds = array<i64: 8, 128>}]} {
    %c0 = arith.constant 0 : index
    %c0_0 = arith.constant 0 : index
    %0 = vector.load %arg1[%c0, %c0_0] : memref<8x16xf32, #tpu.memory_space<vmem>>, vector<8x16xf32>
    %c0_1 = arith.constant 0 : index
    %c0_2 = arith.constant 0 : index
    %1 = vector.load %arg2[%c0_1, %c0_2] : memref<16x64xf32, #tpu.memory_space<vmem>>, vector<16x64xf32>
    %cst = arith.constant dense<0.000000e+00> : vector<8x64xf32>
    %2 = tpu.matmul %0, %1, %cst {dimension_numbers = #tpu.dot_dimension_numbers<[1], [0], [0], [1], [0, 0, 1, 1], [], []>} : vector<8x16xf32>, vector<16x64xf32>, vector<8x64xf32> -> vector<8x64xf32>
    %c0_3 = arith.constant 0 : index
    %c0_4 = arith.constant 0 : index
    %3 = vector.load %arg3[%c0_3, %c0_4] : memref<1x64xf32, #tpu.memory_space<vmem>>, vector<1x64xf32>
    %4 = vector.broadcast %3 : vector<1x64xf32> to vector<8x64xf32>
    %5 = arith.addf %2, %4 : vector<8x64xf32>
    %cst_5 = arith.constant 0.000000e+00 : f32
    %6 = vector.broadcast %cst_5 : f32 to vector<8x64xf32>
    %7 = arith.maximumf %5, %6 : vector<8x64xf32>
    %c0_6 = arith.constant 0 : index
    %c0_7 = arith.constant 0 : index
    %8 = vector.load %arg4[%c0_6, %c0_7] : memref<64x64xf32, #tpu.memory_space<vmem>>, vector<64x64xf32>
    %cst_8 = arith.constant dense<0.000000e+00> : vector<8x64xf32>
    %9 = tpu.matmul %7, %8, %cst_8 {dimension_numbers = #tpu.dot_dimension_numbers<[1], [0], [0], [1], [0, 0, 1, 1], [], []>} : vector<8x64xf32>, vector<64x64xf32>, vector<8x64xf32> -> vector<8x64xf32>
    %c0_9 = arith.constant 0 : index
    %c0_10 = arith.constant 0 : index
    %10 = vector.load %arg5[%c0_9, %c0_10] : memref<1x64xf32, #tpu.memory_space<vmem>>, vector<1x64xf32>
    %11 = vector.broadcast %10 : vector<1x64xf32> to vector<8x64xf32>
    %12 = arith.addf %9, %11 : vector<8x64xf32>
    %cst_11 = arith.constant 0.000000e+00 : f32
    %13 = vector.broadcast %cst_11 : f32 to vector<8x64xf32>
    %14 = arith.maximumf %12, %13 : vector<8x64xf32>
    %c0_12 = arith.constant 0 : index
    %c0_13 = arith.constant 0 : index
    %15 = vector.load %arg6[%c0_12, %c0_13] : memref<64x128xf32, #tpu.memory_space<vmem>>, vector<64x128xf32>
    %cst_14 = arith.constant dense<0.000000e+00> : vector<8x128xf32>
    %16 = tpu.matmul %14, %15, %cst_14 {dimension_numbers = #tpu.dot_dimension_numbers<[1], [0], [0], [1], [0, 0, 1, 1], [], []>} : vector<8x64xf32>, vector<64x128xf32>, vector<8x128xf32> -> vector<8x128xf32>
    %c0_15 = arith.constant 0 : index
    %c0_16 = arith.constant 0 : index
    %17 = vector.load %arg7[%c0_15, %c0_16] : memref<1x128xf32, #tpu.memory_space<vmem>>, vector<1x128xf32>
    %18 = vector.broadcast %17 : vector<1x128xf32> to vector<8x128xf32>
    %19 = arith.addf %16, %18 : vector<8x128xf32>
    %cst_17 = arith.constant dense<0xFF800000> : vector<8xf32>
    %20 = vector.multi_reduction <maximumf>, %19, %cst_17 [1] : vector<8x128xf32> to vector<8xf32>
    %21 = vector.shape_cast %20 : vector<8xf32> to vector<8x1xf32>
    %22 = vector.broadcast %21 : vector<8x1xf32> to vector<8x128xf32>
    %23 = arith.subf %19, %22 : vector<8x128xf32>
    %24 = math.exp %23 : vector<8x128xf32>
    %cst_18 = arith.constant dense<0.000000e+00> : vector<8xf32>
    %25 = vector.multi_reduction <add>, %24, %cst_18 [1] : vector<8x128xf32> to vector<8xf32>
    %26 = vector.shape_cast %25 : vector<8xf32> to vector<8x1xf32>
    %27 = tpu.reciprocal %26 {approx = true} : vector<8x1xf32> -> vector<8x1xf32>
    %28 = vector.broadcast %27 : vector<8x1xf32> to vector<8x128xf32>
    %29 = arith.mulf %24, %28 : vector<8x128xf32>
    %c0_19 = arith.constant 0 : index
    %c0_20 = arith.constant 0 : index
    %30 = vector.load %arg8[%c0_19, %c0_20] : memref<8x128xf32, #tpu.memory_space<vmem>>, vector<8x128xf32>
    tpu.vector_store %arg8[%c0_19, %c0_20], %29 {strides = array<i32>} : memref<8x128xf32, #tpu.memory_space<vmem>>, vector<8x128xf32>,
    return
  }
  func.func @transform_0(%arg0: i32) -> (i32, i32) {
    %c0_i32 = arith.constant 0 : i32
    %c0_i32_0 = arith.constant 0 : i32
    return %arg0, %c0_i32 : i32, i32
  }
  func.func @transform_1(%arg0: i32) -> (i32, i32) {
    %c0_i32 = arith.constant 0 : i32
    %c0_i32_0 = arith.constant 0 : i32
    %c0_i32_1 = arith.constant 0 : i32
    return %c0_i32, %c0_i32_0 : i32, i32
  }
  func.func @transform_2(%arg0: i32) -> (i32, i32) {
    %c0_i32 = arith.constant 0 : i32
    %c0_i32_0 = arith.constant 0 : i32
    %c0_i32_1 = arith.constant 0 : i32
    return %c0_i32, %c0_i32_0 : i32, i32
  }
  func.func @transform_3(%arg0: i32) -> (i32, i32) {
    %c0_i32 = arith.constant 0 : i32
    %c0_i32_0 = arith.constant 0 : i32
    %c0_i32_1 = arith.constant 0 : i32
    return %c0_i32, %c0_i32_0 : i32, i32
  }
  func.func @transform_4(%arg0: i32) -> (i32, i32) {
    %c0_i32 = arith.constant 0 : i32
    %c0_i32_0 = arith.constant 0 : i32
    %c0_i32_1 = arith.constant 0 : i32
    return %c0_i32, %c0_i32_0 : i32, i32
  }
  func.func @transform_5(%arg0: i32) -> (i32, i32) {
    %c0_i32 = arith.constant 0 : i32
    %c0_i32_0 = arith.constant 0 : i32
    %c0_i32_1 = arith.constant 0 : i32
    return %c0_i32, %c0_i32_0 : i32, i32
  }
  func.func @transform_6(%arg0: i32) -> (i32, i32) {
    %c0_i32 = arith.constant 0 : i32
    %c0_i32_0 = arith.constant 0 : i32
    %c0_i32_1 = arith.constant 0 : i32
    return %c0_i32, %c0_i32_0 : i32, i32
  }
  func.func @transform_7(%arg0: i32) -> (i32, i32) {
    %c0_i32 = arith.constant 0 : i32
    %c0_i32_0 = arith.constant 0 : i32
    return %arg0, %c0_i32 : i32, i32
  }
}

</mosaic_0001>

<bundles_post_ra>
// kernel: tpu_custom_call.1
= control target key start
LH: loop header
LB: loop body
LE: loop exit
PB: predicated region body
PF: predicated region fallthrough
CT: control target
= control target key end

     0   :  { %12 = vsyncpa [#allocation3], 0  ;;  %s671_s0 = inlined_call_operand.hbm [shape: f32[8,16], index: 0, kind: input, shape index: {}]   ;;  %s672_s1 = inlined_call_operand.hbm [shape: f32[16,64], index: 1, kind: input, shape index: {}]   ;;  %s673_s2 = inlined_call_operand.vmem [shape: f32[1,64], index: 2, kind: input, shape index: {}]   ;;  %s674_s3 = inlined_call_operand.hbm [shape: f32[64,64], index: 3, kind: input, shape index: {}]   ;;  %s675_s4 = inlined_call_operand.vmem [shape: f32[1,64], index: 4, kind: input, shape index: {}]   ;;  %s676_s5 = inlined_call_operand.hbm [shape: f32[64,128], index: 5, kind: input, shape index: {}]   ;;  %s677_s6 = inlined_call_operand.vmem [shape: f32[1,128], index: 6, kind: input, shape index: {}]   ;;  %s678_s7 = inlined_call_operand.hbm [shape: f32[8,128], index: 7, kind: output, shape index: {}]  }
   0x1   :  { %13 = vsyncpa [#allocation6], 0 }
   0x2   :  { %14 = vsyncpa [#allocation9], 0 }
   0x3   :  { %15 = vsyncpa [#allocation4], 0  ;;  %s563_s24 = smov [#allocation5]  }
   0x4   :  { %s31_s25 = sshll.u32 %s563_s24, 4  ;;  %s32_s25 = int_to_ptr.vmem [resolvable:$true] %s31_s25 }
   0x5   :  { %s463_s26 = scalar_lea.vmem %s32_s25, 256  ;;  %p468_p1 = scmp.lt.s32.totalorder %s32_s25, %s32_s25 }
   0x6   :  { %p464_p0 = scmp.ne.s32.totalorder %s32_s25, %s463_s26  ;;  %p469_p2 = scmp.lt.s32.totalorder %s463_s26, %s463_s26 }
   0x8   :  { %p470_p3 = por %p469_p2, %p468_p1 }
   0xa   :  { %p471_p4 = pnand %p470_p3, %p464_p0 }
   0xc   :  { %474 = shalt.err (!%p471_p4)
}
   0xd   :  { %s564_s27 = smov 128   ;;  %s565_s28 = smov 8  }
   0xe   :  { %37 = dma.hbm_to_vmem [thread:$0]  %s672_s1, 256, %s32_s25, [#allocation6], %s564_s27, %s564_s27, %s565_s28  }
   0xf   :  { %s566_s8 = smov [#allocation2]   ;;  %s567_s10 = smov [#allocation7]  }
  0x10   :  { %s22_s9 = sshll.u32 %s566_s8, 4  ;;  %s45_s11 = sshll.u32 %s567_s10, 4  ;;  %s23_s9 = int_to_ptr.vmem [resolvable:$true] %s22_s9  ;;  %s46_s11 = int_to_ptr.vmem [resolvable:$true] %s45_s11 }
  0x11   :  { %s483_s12 = scalar_lea.vmem %s23_s9, 128  ;;  %p488_p6 = scmp.lt.s32.totalorder %s23_s9, %s23_s9 }
  0x12   :  { %p484_p5 = scmp.ne.s32.totalorder %s23_s9, %s483_s12  ;;  %p489_p7 = scmp.lt.s32.totalorder %s483_s12, %s483_s12 }
  0x14   :  { %p490_p8 = por %p489_p7, %p488_p6 }
  0x16   :  { %p491_p9 = pnand %p490_p8, %p484_p5 }
  0x18   :  { %494 = shalt.err (!%p491_p9)
}
  0x19   :  { %25 = dma.hbm_to_vmem [thread:$0]  %s671_s0, 128, %s23_s9, [#allocation3]  }
  0x1a   :  { %s503_s15 = scalar_lea.vmem %s46_s11, 1024  ;;  %p508_p11 = scmp.lt.s32.totalorder %s46_s11, %s46_s11 }
  0x1b   :  { %p504_p10 = scmp.ne.s32.totalorder %s46_s11, %s503_s15  ;;  %p509_p12 = scmp.lt.s32.totalorder %s503_s15, %s503_s15 }
  0x1d   :  { %p510_p13 = por %p509_p12, %p508_p11 }
  0x1f   :  { %p511_p0 = pnand %p510_p13, %p504_p10 }
  0x21   :  { %514 = shalt.err (!%p511_p0)
}
  0x22   :  { %51 = dma.hbm_to_vmem [thread:$0]  %s674_s3, 1024, %s46_s11, [#allocation6], %s564_s27, %s564_s27, %s565_s28  }
  0x23   :  { %s568_s17 = smov [#allocation8]  }
  0x24   :  { %s59_s18 = sshll.u32 %s568_s17, 4  ;;  %s60_s18 = int_to_ptr.vmem [resolvable:$true] %s59_s18 }
  0x25   :  { %s523_s19 = scalar_lea.vmem %s60_s18, 1024  ;;  %p528_p2 = scmp.lt.s32.totalorder %s60_s18, %s60_s18 }
  0x26   :  { %p524_p1 = scmp.ne.s32.totalorder %s60_s18, %s523_s19  ;;  %p529_p3 = scmp.lt.s32.totalorder %s523_s19, %s523_s19 }
  0x28   :  { %p530_p4 = por %p529_p3, %p528_p2 }
  0x2a   :  { %p531_p5 = pnand %p530_p4, %p524_p1 }
  0x2c   :  { %534 = shalt.err (!%p531_p5)
}
  0x2d   :  { %65 = dma.hbm_to_vmem [thread:$0]  %s676_s5, 1024, %s60_s18, [#allocation9], %s564_s27, %s564_s27, %s565_s28  }
  0x2e   :  { %555 = dma.done.wait [#allocation3], 128  }
  0x2f   :  { %556 = vsyncadd [#allocation3], 4294967168 }
  0x30   :  { %557 = dma.done.wait [#allocation6], 1280  }
  0x31   :  { %558 = vsyncadd [#allocation6], 4294966016 }
  0x32   :  { %559 = dma.done.wait [#allocation9], 1024  }
  0x33   :  { %560 = vsyncadd [#allocation9], 4294966272  ;;  %v569_v0 = vmov 0.0   ;;  %vm570_vm0 = vmmov 0   ;;  %v82_v1 = vld [vmem:[#allocation5 + $0x8] sm:$0xff]  ;;  %v81_v2 = vld [vmem:[#allocation5] sm:$0xff] }
  0x34   :  { %397 = vmatprep.subr.mxu0 %v569_v0  ;;  %401 = vmatprep.mubr.msk.f32.mxu0 %vm570_vm0, %v569_v0  ;;  %v80_v3 = vld [vmem:[#allocation2] sm:$0xff]  ;;  %vm90_vm1 = vcmask 130048   ;;  %v172_v4 = vld [vmem:[#allocation7 + $0x38] sm:$0xff]  ;;  %v171_v5 = vld [vmem:[#allocation7 + $0x30] sm:$0xff]  ;;  %vm180_vm2 = vcmask 523264  }
  0x35   :  { %404 = vmatprep.subr.mxu1 %v569_v0  ;;  %420 = vmatprep.mubr.msk.f32.mxu1 %vm570_vm0, %v569_v0  ;;  %v170_v6 = vld [vmem:[#allocation7 + $0x28] sm:$0xff]  ;;  %v169_v7 = vld [vmem:[#allocation7 + $0x20] sm:$0xff]  ;;  %v168_v8 = vld [vmem:[#allocation7 + $0x18] sm:$0xff] }
  0x36   :  { %398 = vmatpush3.msra.mxu0 %v82_v1  ;;  %405 = vmatpush3.msra.mxu1 %v172_v4  ;;  %v167_v9 = vld [vmem:[#allocation7 + $0x10] sm:$0xff]  ;;  %v166_v10 = vld [vmem:[#allocation7 + $0x8] sm:$0xff]  ;;  %v165_v11 = vld [vmem:[#allocation7] sm:$0xff] }
  0x37   :  { %399 = vmatprep.subr.mxu0 %v569_v0  ;;  %406 = vmatprep.subr.mxu1 %v569_v0  ;;  %v262_v12 = vld [vmem:[#allocation8 + $0x38] sm:$0xff]  ;;  %v261_v13 = vld [vmem:[#allocation8 + $0x30] sm:$0xff]  ;;  %v260_v14 = vld [vmem:[#allocation8 + $0x28] sm:$0xff] }
  0x38   :  { %400 = vmatpush3.msra.mxu0 %v81_v2  ;;  %407 = vmatpush3.msra.mxu1 %v171_v5  ;;  %v259_v15 = vld [vmem:[#allocation8 + $0x20] sm:$0xff]  ;;  %v258_v16 = vld [vmem:[#allocation8 + $0x18] sm:$0xff]  ;;  %v370_v17 = vld [vmem:[%s673_s2] ss:$0 sm:$0xff] }
  0x39   :  { %402 = vmatmul.mubr.msk.f32.vlgmr.msra.gmra.mxu0 %vm90_vm1, %v80_v3  ;;  %408 = vmatprep.subr.mxu1 %v569_v0  ;;  %v257_v22 = vld [vmem:[#allocation8 + $0x10] sm:$0xff]  ;;  %v256_v23 = vld [vmem:[#allocation8 + $0x8] sm:$0xff]  ;;  %v255_v24 = vld [vmem:[#allocation8] sm:$0xff] }
  0x3a   :  { %423 = vmatprep.subr.mxu0 %v569_v0  ;;  %409 = vmatpush3.msra.mxu1 %v170_v6  ;;  %v372_v25 = vld [vmem:[%s675_s4] ss:$0 sm:$0xff]  ;;  %s571_s4 = smov [#allocation10]  }
  0x3b   :  { %439 = vmatprep.mubr.msk.f32.mxu0 %vm570_vm0, %v569_v0  ;;  %410 = vmatprep.subr.mxu1 %v569_v0  ;;  %v374_v30 = vld [vmem:[%s677_s6] ss:$0 sm:$0xff]  ;;  %s359_s24 = sshll.u32 %s571_s4, 4  ;;  %s360_s24 = int_to_ptr.vmem [resolvable:$true] %s359_s24 }
  0x3c   :  { %411 = vmatpush3.msra.mxu1 %v169_v7  ;;  %424 = vmatpush3.msra.mxu0 %v262_v12  ;;  %s535_s25 = scalar_lea.vmem %s360_s24, 128  ;;  %p540_p7 = scmp.lt.s32.totalorder %s360_s24, %s360_s24 }
  0x3d   :  { %412 = vmatprep.subr.mxu1 %v569_v0  ;;  %425 = vmatprep.subr.mxu0 %v569_v0  ;;  %p536_p6 = scmp.ne.s32.totalorder %s360_s24, %s535_s25  ;;  %p541_p8 = scmp.lt.s32.totalorder %s535_s25, %s535_s25 }
  0x3e   :  { %413 = vmatpush3.msra.mxu1 %v168_v8  ;;  %426 = vmatpush3.msra.mxu0 %v261_v13 }
  0x3f   :  { %414 = vmatprep.subr.mxu1 %v569_v0  ;;  %427 = vmatprep.subr.mxu0 %v569_v0  ;;  %p542_p9 = por %p541_p8, %p540_p7 }
  0x40   :  { %415 = vmatpush3.msra.mxu1 %v167_v9  ;;  %428 = vmatpush3.msra.mxu0 %v260_v14 }
  0x41   :  { %416 = vmatprep.subr.mxu1 %v569_v0  ;;  %429 = vmatprep.subr.mxu0 %v569_v0  ;;  %p543_p10 = pnand %p542_p9, %p536_p6 }
  0x42   :  { %417 = vmatpush3.msra.mxu1 %v166_v10  ;;  %430 = vmatpush3.msra.mxu0 %v259_v15 }
  0x43   :  { %418 = vmatprep.subr.mxu1 %v569_v0  ;;  %431 = vmatprep.subr.mxu0 %v569_v0 }
  0x44   :  { %419 = vmatpush3.msra.mxu1 %v165_v11  ;;  %432 = vmatpush3.msra.mxu0 %v258_v16 }
  0x45   :  { %433 = vmatprep.subr.mxu0 %v569_v0 }
  0x46   :  { %434 = vmatpush3.msra.mxu0 %v257_v22 }
  0x47   :  { %435 = vmatprep.subr.mxu0 %v569_v0 }
  0x48   :  { %436 = vmatpush3.msra.mxu0 %v256_v23 }
  0x49   :  { %437 = vmatprep.subr.mxu0 %v569_v0 }
  0x4a   :  { %438 = vmatpush3.msra.mxu0 %v255_v24 }
  0xf9   :  { %v160_v18 = vpop.f32.mrf.mxu0 }
  0xfa   :  { %v161_v19 = vadd.f32 %v370_v17, %v160_v18 }
  0xfb   :  { %v403_v20 = vpop.f32.mrf.mxu0 }
  0xfc   :  { %v164_v21 = vmax.f32 %v161_v19, 0.0 }
  0xfe   :  { %421 = vmatmul.mubr.msk.f32.vlgmr.msra.gmra.mxu1 %vm180_vm2, %v164_v21 }
 0x1be   :  { %v250_v26 = vpop.f32.mrf.mxu1 }
 0x1bf   :  { %v251_v27 = vadd.f32 %v372_v25, %v250_v26 }
 0x1c0   :  { %v422_v28 = vpop.f32.mrf.mxu1 }
 0x1c1   :  { %v254_v29 = vmax.f32 %v251_v27, 0.0 }
 0x1c3   :  { %440 = vmatmul.mubr.msk.f32.vlgmr.msra.gmra.mxu0 %vm180_vm2, %v254_v29 }
 0x283   :  { %v339_v31 = vpop.f32.mrf.mxu0 }
 0x284   :  { %v340_v32 = vadd.f32 %v374_v30, %v339_v31 }
 0x285   :  { %v441_v33 = vpop.f32.mrf.mxu0 }
 0x286   :  { %343 = vmax.xlane.f32.xlu0 %v340_v32 }
 0x30f   :  { %v344_v34 = vpop.xlane.xlu0 %343 }
 0x310   :  { %v345_v35 = vsub.f32 %v340_v32, %v344_v34 }
 0x312   :  { %v346_v36 = vmul.f32 1.442695, %v345_v35 }
 0x314   :  { %451 = vpow2.f32 %v346_v36 }
 0x321   :  { %v452_v37 = vpop.eup %451 }
 0x322   :  { %348 = vadd.xlane.f32.xlu0 %v452_v37 }
 0x3ab   :  { %v349_v38 = vpop.xlane.xlu0 %348 }
 0x3ac   :  { %453 = vrcp.f32 %v349_v38 }
 0x3b9   :  { %v454_v39 = vpop.eup %453 }
 0x3ba   :  { %v351_v40 = vmul.f32 %v454_v39, %v452_v37 }
 0x3bc   :  { %352 = vst [vmem:[#allocation10] sm:$0xff] %v351_v40 }
 0x3bd   :  { %546 = shalt.err (!%p543_p10)
}
 0x3be   :  { %362 = dma.vmem_to_hbm [thread:$0]  %s360_s24, 128, %s678_s7, [#allocation4]  }
 0x3bf   :  { %561 = dma.done.wait [#allocation4], 128  }
 0x3c0   :  { %562 = vsyncadd [#allocation4], 4294967168 }
 0x3c1   :  { %366 = vsyncpa [#allocation3], 1 }
 0x3c2   :  { %367 = vsyncpa [#allocation6], 1 }
 0x3c3   :  { %368 = vsyncpa [#allocation9], 1 }
 0x3c4   :  { %369 = vsyncpa [#allocation4], 1 }

</bundles_post_ra>
